<compile_context>
chip_gen: v7x
topology: tpu7x:2x2x1
jax: 0.10.0
libtpu: 0.0.40
codegen_flags: <defaults>
</compile_context>

<pallas_src>
import functools
import math

import numpy as np

import jax
import jax.numpy as jnp
from jax.experimental import pallas as pl
from jax.experimental.pallas import tpu as pltpu


# Tap order t = kh*3 + kw  (matches the flattened w2 layout built in the wrapper).
_TAPS = tuple((kh - 1, kw - 1) for kh in range(3) for kw in range(3))


def _full_spec(shape):
    nd = len(shape)
    return pl.BlockSpec(shape, lambda g: (0,) * nd)


def _make_tap_masks(H, W):
    """(9, 1, H*W) f32 validity masks for the 9 3x3 taps (precomputed, numpy)."""
    HW = H * W
    r = np.arange(HW) // W
    c = np.arange(HW) % W
    masks = np.zeros((9, 1, HW), np.float32)
    for t, (dh, dw) in enumerate(_TAPS):
        valid = (r + dh >= 0) & (r + dh < H) & (c + dw >= 0) & (c + dw < W)
        masks[t, 0, :] = valid.astype(np.float32)
    return masks


def _bottleneck_kernel(x_ref, mask_ref, w1_ref, b1_ref, w2_ref, b2_ref,
                       w3_ref, b3_ref, o_ref, *, W, HW):
    ipb = x_ref.shape[0]              # images per block
    width = w1_ref.shape[0]
    cdt = w1_ref.dtype                # matmul/patch dtype (bf16 or f32)
    lanes = ipb * HW

    # ---- fuse the image block along lanes: (Cin, ipb*HW), f32 ---------------
    if ipb == 1:
        xs = x_ref[0]
    else:
        xs = jnp.concatenate([x_ref[i] for i in range(ipb)], axis=1)

    # ---- conv1 (1x1) + BN1 + ReLU  (BN scale pre-folded into w1) ------------
    h1 = jnp.dot(w1_ref[...], xs.astype(cdt),
                 preferred_element_type=jnp.float32)
    h1 = jnp.maximum(h1 + b1_ref[...], 0.0)          # (width, lanes) f32

    # TODO(synk): drop_rate > 0.0 (training-mode F.dropout) not implemented;
    # this instance uses drop_rate=0.0 so the branch is statically skipped.

    # ---- conv2 (3x3, stride=1, pad=1) as ONE im2col matmul ------------------
    # Patch built in-register (no VMEM scratch): 9 lane-rolled, boundary-masked
    # copies of h1 (already in compute dtype), concatenated along sublanes.
    # Masks are tiled per image, so roll wrap across image boundaries is
    # exactly the masked edge positions.
    h1c = h1.astype(cdt)
    tiles = []
    for t, (dh, dw) in enumerate(_TAPS):
        delta = dh * W + dw
        if delta:
            shifted = pltpu.roll(h1c, (-delta) % lanes, 1) * mask_ref[t]
        else:
            shifted = h1c
        tiles.append(shifted)
    patch = jnp.concatenate(tiles, axis=0)            # (9*width, lanes), cdt
    h2 = jnp.dot(w2_ref[...], patch, preferred_element_type=jnp.float32)
    h2 = jnp.maximum(h2 + b2_ref[...], 0.0)           # (width, lanes) f32

    # ---- conv3 (1x1) + BN3 + residual add + ReLU -----------------------------
    # downsample is None and stride == 1 -> residual is the raw input slab.
    h3 = jnp.dot(w3_ref[...], h2.astype(cdt),
                 preferred_element_type=jnp.float32)
    out = jnp.maximum(h3 + b3_ref[...] + xs, 0.0)     # (Cout, lanes) f32
    # TODO(synk): optionally fold the residual into conv3 via [w3 | I] if VALU
    # ever becomes the saturating slot (measure first).

    if ipb == 1:
        o_ref[0] = out.astype(o_ref.dtype)
    else:
        for i in range(ipb):
            o_ref[i] = out[:, i * HW:(i + 1) * HW].astype(o_ref.dtype)


def _default_compute_dtype():
    """bf16 on v6e/v7x (MXU-native), f32 on v5e / unknown (no bf16 VALU path)."""
    try:
        kind = jax.devices()[0].device_kind.lower()
    except Exception:
        kind = ""
    if "v6" in kind or "v7" in kind or "7x" in kind:
        return jnp.bfloat16
    return jnp.float32


def bottleneck_forward(x_nchw, params, *, compute_dtype=None,
                       images_per_block=None):
    N, Cin, H, W = x_nchw.shape
    HW = H * W
    width = params["w1"].shape[0]
    Cout = params["w3"].shape[0]
    assert Cin == Cout, "no downsample -> inplanes must equal planes*4"

    if compute_dtype is None:
        compute_dtype = _default_compute_dtype()
    if images_per_block is None:
        # One fused grid step over the whole batch: fewer, wider matmuls and a
        # single ~0.35us step; explicit override available for large batches.
        images_per_block = N
    assert N % images_per_block == 0
    grid = (N // images_per_block,)
    lanes = images_per_block * HW

    # Free reshape only — no NCHW<->NHWC transposes anywhere in the wrapper.
    x = x_nchw.reshape(N, Cin, HW).astype(jnp.float32)

    f32 = jnp.float32
    s1 = params["s1"].astype(f32); b1 = params["b1"].astype(f32)
    s2 = params["s2"].astype(f32); b2 = params["b2"].astype(f32)
    s3 = params["s3"].astype(f32); b3 = params["b3"].astype(f32)

    # Fold BN scales into the conv weights (in f32, then cast to compute dtype).
    w1m = (params["w1"].astype(f32) * s1[:, None]).astype(compute_dtype)   # (width, Cin)
    w2f = params["w2"].astype(f32) * s2[:, None, None, None]               # OIHW, scaled
    w2m = jnp.transpose(w2f, (0, 2, 3, 1)).reshape(
        width, 9 * width).astype(compute_dtype)                            # (width, 9*width)
    w3m = (params["w3"].astype(f32) * s3[:, None]).astype(compute_dtype)   # (Cout, width)

    b1c = b1.reshape(width, 1)
    b2c = b2.reshape(width, 1)
    b3c = b3.reshape(Cout, 1)

    # Per-image tap masks, tiled across the fused image block, in compute dtype
    # (0/1 exactly representable) so the tap loop never leaves cdt.
    masks = np.tile(_make_tap_masks(H, W), (1, 1, images_per_block))
    masks = jnp.asarray(masks).astype(compute_dtype)                        # (9, 1, lanes)

    ordered = (masks, w1m, b1c, w2m, b2c, w3m, b3c)
    kernel = functools.partial(_bottleneck_kernel, W=W, HW=HW)

    flops = 2 * N * HW * (Cin * width + 9 * width * width + width * Cout)
    bytes_accessed = (int(x.size) * 4 + N * Cout * HW * 4
                      + sum(int(a.size) * a.dtype.itemsize for a in ordered))

    # TODO(synk): at real ResNet sizes (e.g. 56x56x256) add row-block spatial
    # tiling with a 1-row halo, row-block heights chosen so rows*W is a
    # multiple of 128, and an explicit vmem_limit_bytes budget (v7x has only
    # 64 MiB VMEM); at this size the fused (C, N*H*W) slab trivially fits.
    out = pl.pallas_call(
        kernel,
        out_shape=jax.ShapeDtypeStruct((N, Cout, HW), jnp.float32),
        grid_spec=pltpu.PrefetchScalarGridSpec(
            num_scalar_prefetch=0,
            grid=grid,
            in_specs=[pl.BlockSpec((images_per_block, Cin, HW),
                                   lambda g: (g, 0, 0))]
                     + [_full_spec(a.shape) for a in ordered],
            out_specs=pl.BlockSpec((images_per_block, Cout, HW),
                                   lambda g: (g, 0, 0)),
        ),
        compiler_params=pltpu.CompilerParams(
            dimension_semantics=("parallel",)),
        cost_estimate=pl.CostEstimate(flops=int(flops), transcendentals=0,
                                      bytes_accessed=int(bytes_accessed)),
    )(x, *ordered)

    return out.reshape(N, Cout, H, W)


def init_params(key, inplanes, planes, cardinality=1, base_width=64, eps=1e-5):
    width = int(math.floor(planes * (base_width / 64)) * cardinality)
    outplanes = planes * 4
    ks = jax.random.split(key, 15)

    def kaiming(k, shape, fan_in):
        return math.sqrt(2.0 / fan_in) * jax.random.normal(k, shape, jnp.float32)

    # PyTorch-native layouts: 1x1 convs (O, I); 3x3 conv OIHW.
    w1 = kaiming(ks[0], (width, inplanes), inplanes)
    w2 = kaiming(ks[1], (width, width, 3, 3), 9 * width)
    w3 = kaiming(ks[2], (outplanes, width), width)

    def bn_fold(kg, kb, km, kv, c):
        gamma = jax.random.uniform(kg, (c,), jnp.float32, 0.5, 1.5)
        beta = jax.random.uniform(kb, (c,), jnp.float32, -0.5, 0.5)
        mean = jax.random.uniform(km, (c,), jnp.float32, -0.5, 0.5)
        var = jax.random.uniform(kv, (c,), jnp.float32, 0.5, 1.5)
        scale = gamma / jnp.sqrt(var + eps)
        bias = beta - mean * scale
        return scale, bias

    s1, b1 = bn_fold(ks[3], ks[4], ks[5], ks[6], width)
    s2, b2 = bn_fold(ks[7], ks[8], ks[9], ks[10], width)
    s3, b3 = bn_fold(ks[11], ks[12], ks[13], ks[14], outplanes)
    return dict(w1=w1, s1=s1, b1=b1, w2=w2, s2=s2, b2=b2, w3=w3, s3=s3, b3=b3)


def reference(x_nchw, params):
    # Pure-JAX reference (same math, XLA convs at HIGHEST precision).
    dn = ("NCHW", "OIHW", "NCHW")
    prec = jax.lax.Precision.HIGHEST

    def bn(h, s, b):
        return h * s[None, :, None, None] + b[None, :, None, None]

    w1 = params["w1"][:, :, None, None]
    w3 = params["w3"][:, :, None, None]
    h = jax.lax.conv_general_dilated(x_nchw, w1, (1, 1), "VALID",
                                     dimension_numbers=dn, precision=prec)
    h = jnp.maximum(bn(h, params["s1"], params["b1"]), 0.0)
    h = jax.lax.conv_general_dilated(h, params["w2"], (1, 1), ((1, 1), (1, 1)),
                                     dimension_numbers=dn, precision=prec)
    h = jnp.maximum(bn(h, params["s2"], params["b2"]), 0.0)
    h = jax.lax.conv_general_dilated(h, w3, (1, 1), "VALID",
                                     dimension_numbers=dn, precision=prec)
    h = bn(h, params["s3"], params["b3"])
    return jnp.maximum(h + x_nchw, 0.0)


if __name__ == "__main__":
    # TODO(synk): stride > 1, cardinality > 1 (grouped conv) and the downsample
    # branch are not exercised by this instantiation and are not implemented.
    key = jax.random.PRNGKey(0)
    N, inplanes, planes, H, W = 2, 16, 4, 16, 16

    params = init_params(key, inplanes, planes)
    x = jax.random.normal(jax.random.fold_in(key, 99),
                          (N, inplanes, H, W), jnp.float32)

    ref = jax.block_until_ready(reference(x, params))
    scale = 1.0 + float(jnp.max(jnp.abs(ref)))

    # f32 operands (v5e default path): tight-ish check.
    out32 = jax.block_until_ready(
        bottleneck_forward(x, params, compute_dtype=jnp.float32))
    assert out32.shape == (N, planes * 4, H, W)
    err32 = float(jnp.max(jnp.abs(out32 - ref)))
    if err32 > 5e-2 * scale:
        raise AssertionError(f"f32 Pallas output mismatch vs reference: {err32}")

    # bf16 operands (MXU-native on v6e/v7x), f32 accumulation: looser tolerance.
    outbf = jax.block_until_ready(
        bottleneck_forward(x, params, compute_dtype=jnp.bfloat16))
    errbf = float(jnp.max(jnp.abs(outbf - ref)))
    if errbf > 1.5e-1 * scale:
        raise AssertionError(f"bf16 Pallas output mismatch vs reference: {errbf}")

    # Also exercise the split-grid path (one image per grid step).
    out_split = jax.block_until_ready(
        bottleneck_forward(x, params, compute_dtype=jnp.float32,
                           images_per_block=1))
    err_split = float(jnp.max(jnp.abs(out_split - ref)))
    if err_split > 5e-2 * scale:
        raise AssertionError(f"split-grid Pallas output mismatch: {err_split}")

    print("KERNEL_OK")
</pallas_src>

<mosaic_0001>
module attributes {stable_mosaic.version = 11 : i64} {
  func.func @_bottleneck_kernel(%arg0: i32, %arg1: memref<2x16x256xf32, #tpu.memory_space<vmem>>, %arg2: memref<9x1x512xf32, #tpu.memory_space<vmem>>, %arg3: memref<4x16xf32, #tpu.memory_space<vmem>>, %arg4: memref<4x1xf32, #tpu.memory_space<vmem>>, %arg5: memref<4x36xf32, #tpu.memory_space<vmem>>, %arg6: memref<4x1xf32, #tpu.memory_space<vmem>>, %arg7: memref<16x4xf32, #tpu.memory_space<vmem>>, %arg8: memref<16x1xf32, #tpu.memory_space<vmem>>, %arg9: memref<2x16x256xf32, #tpu.memory_space<vmem>>) attributes {dimension_semantics = [#tpu.dimension_semantics<parallel>], iteration_bounds = array<i64: 1>, scalar_prefetch = 0 : i64, scratch_operands = 0 : i64, tpu.core_type = #tpu.core_type<tc>, window_params = [{transform_indices = @transform_0, window_bounds = array<i64: 2, 16, 256>}, {pipeline_mode = #tpu.pipeline_mode<synchronous>, transform_indices = @transform_1, window_bounds = array<i64: 9, 1, 512>}, {pipeline_mode = #tpu.pipeline_mode<synchronous>, transform_indices = @transform_2, window_bounds = array<i64: 4, 16>}, {pipeline_mode = #tpu.pipeline_mode<synchronous>, transform_indices = @transform_3, window_bounds = array<i64: 4, 1>}, {pipeline_mode = #tpu.pipeline_mode<synchronous>, transform_indices = @transform_4, window_bounds = array<i64: 4, 36>}, {pipeline_mode = #tpu.pipeline_mode<synchronous>, transform_indices = @transform_5, window_bounds = array<i64: 4, 1>}, {pipeline_mode = #tpu.pipeline_mode<synchronous>, transform_indices = @transform_6, window_bounds = array<i64: 16, 4>}, {pipeline_mode = #tpu.pipeline_mode<synchronous>, transform_indices = @transform_7, window_bounds = array<i64: 16, 1>}, {transform_indices = @transform_8, window_bounds = array<i64: 2, 16, 256>}]} {
    %c0 = arith.constant 0 : index
    %c0_0 = arith.constant 0 : index
    %c0_1 = arith.constant 0 : index
    %0 = vector.load %arg1[%c0, %c0_0, %c0_1] : memref<2x16x256xf32, #tpu.memory_space<vmem>>, vector<1x16x256xf32>
    %1 = vector.shape_cast %0 : vector<1x16x256xf32> to vector<16x256xf32>
    %c1 = arith.constant 1 : index
    %c0_2 = arith.constant 0 : index
    %c0_3 = arith.constant 0 : index
    %2 = vector.load %arg1[%c1, %c0_2, %c0_3] : memref<2x16x256xf32, #tpu.memory_space<vmem>>, vector<1x16x256xf32>
    %3 = vector.shape_cast %2 : vector<1x16x256xf32> to vector<16x256xf32>
    %4 = tpu.concatenate %1, %3 in 1 : vector<16x256xf32>, vector<16x256xf32> -> vector<16x512xf32>
    %c0_4 = arith.constant 0 : index
    %c0_5 = arith.constant 0 : index
    %5 = vector.load %arg3[%c0_4, %c0_5] : memref<4x16xf32, #tpu.memory_space<vmem>>, vector<4x16xf32>
    %cst = arith.constant dense<0.000000e+00> : vector<4x512xf32>
    %6 = tpu.matmul %5, %4, %cst {dimension_numbers = #tpu.dot_dimension_numbers<[1], [0], [0], [1], [0, 0, 1, 1], [], []>} : vector<4x16xf32>, vector<16x512xf32>, vector<4x512xf32> -> vector<4x512xf32>
    %c0_6 = arith.constant 0 : index
    %c0_7 = arith.constant 0 : index
    %7 = vector.load %arg4[%c0_6, %c0_7] : memref<4x1xf32, #tpu.memory_space<vmem>>, vector<4x1xf32>
    %8 = vector.broadcast %7 : vector<4x1xf32> to vector<4x512xf32>
    %9 = arith.addf %6, %8 : vector<4x512xf32>
    %cst_8 = arith.constant 0.000000e+00 : f32
    %10 = vector.broadcast %cst_8 : f32 to vector<4x512xf32>
    %11 = arith.maximumf %9, %10 : vector<4x512xf32>
    %c17_i32 = arith.constant 17 : i32
    %12 = tpu.dynamic_rotate %11 by %c17_i32 dim 1 : vector<4x512xf32>, i32 -> vector<4x512xf32>
    %c0_9 = arith.constant 0 : index
    %c0_10 = arith.constant 0 : index
    %c0_11 = arith.constant 0 : index
    %13 = vector.load %arg2[%c0_9, %c0_10, %c0_11] : memref<9x1x512xf32, #tpu.memory_space<vmem>>, vector<1x1x512xf32>
    %14 = vector.shape_cast %13 : vector<1x1x512xf32> to vector<1x512xf32>
    %15 = vector.broadcast %14 : vector<1x512xf32> to vector<4x512xf32>
    %16 = arith.mulf %12, %15 : vector<4x512xf32>
    %c16_i32 = arith.constant 16 : i32
    %17 = tpu.dynamic_rotate %11 by %c16_i32 dim 1 : vector<4x512xf32>, i32 -> vector<4x512xf32>
    %c1_12 = arith.constant 1 : index
    %c0_13 = arith.constant 0 : index
    %c0_14 = arith.constant 0 : index
    %18 = vector.load %arg2[%c1_12, %c0_13, %c0_14] : memref<9x1x512xf32, #tpu.memory_space<vmem>>, vector<1x1x512xf32>
    %19 = vector.shape_cast %18 : vector<1x1x512xf32> to vector<1x512xf32>
    %20 = vector.broadcast %19 : vector<1x512xf32> to vector<4x512xf32>
    %21 = arith.mulf %17, %20 : vector<4x512xf32>
    %c15_i32 = arith.constant 15 : i32
    %22 = tpu.dynamic_rotate %11 by %c15_i32 dim 1 : vector<4x512xf32>, i32 -> vector<4x512xf32>
    %c2 = arith.constant 2 : index
    %c0_15 = arith.constant 0 : index
    %c0_16 = arith.constant 0 : index
    %23 = vector.load %arg2[%c2, %c0_15, %c0_16] : memref<9x1x512xf32, #tpu.memory_space<vmem>>, vector<1x1x512xf32>
    %24 = vector.shape_cast %23 : vector<1x1x512xf32> to vector<1x512xf32>
    %25 = vector.broadcast %24 : vector<1x512xf32> to vector<4x512xf32>
    %26 = arith.mulf %22, %25 : vector<4x512xf32>
    %c1_i32 = arith.constant 1 : i32
    %27 = tpu.dynamic_rotate %11 by %c1_i32 dim 1 : vector<4x512xf32>, i32 -> vector<4x512xf32>
    %c3 = arith.constant 3 : index
    %c0_17 = arith.constant 0 : index
    %c0_18 = arith.constant 0 : index
    %28 = vector.load %arg2[%c3, %c0_17, %c0_18] : memref<9x1x512xf32, #tpu.memory_space<vmem>>, vector<1x1x512xf32>
    %29 = vector.shape_cast %28 : vector<1x1x512xf32> to vector<1x512xf32>
    %30 = vector.broadcast %29 : vector<1x512xf32> to vector<4x512xf32>
    %31 = arith.mulf %27, %30 : vector<4x512xf32>
    %c511_i32 = arith.constant 511 : i32
    %32 = tpu.dynamic_rotate %11 by %c511_i32 dim 1 : vector<4x512xf32>, i32 -> vector<4x512xf32>
    %c5 = arith.constant 5 : index
    %c0_19 = arith.constant 0 : index
    %c0_20 = arith.constant 0 : index
    %33 = vector.load %arg2[%c5, %c0_19, %c0_20] : memref<9x1x512xf32, #tpu.memory_space<vmem>>, vector<1x1x512xf32>
    %34 = vector.shape_cast %33 : vector<1x1x512xf32> to vector<1x512xf32>
    %35 = vector.broadcast %34 : vector<1x512xf32> to vector<4x512xf32>
    %36 = arith.mulf %32, %35 : vector<4x512xf32>
    %c497_i32 = arith.constant 497 : i32
    %37 = tpu.dynamic_rotate %11 by %c497_i32 dim 1 : vector<4x512xf32>, i32 -> vector<4x512xf32>
    %c6 = arith.constant 6 : index
    %c0_21 = arith.constant 0 : index
    %c0_22 = arith.constant 0 : index
    %38 = vector.load %arg2[%c6, %c0_21, %c0_22] : memref<9x1x512xf32, #tpu.memory_space<vmem>>, vector<1x1x512xf32>
    %39 = vector.shape_cast %38 : vector<1x1x512xf32> to vector<1x512xf32>
    %40 = vector.broadcast %39 : vector<1x512xf32> to vector<4x512xf32>
    %41 = arith.mulf %37, %40 : vector<4x512xf32>
    %c496_i32 = arith.constant 496 : i32
    %42 = tpu.dynamic_rotate %11 by %c496_i32 dim 1 : vector<4x512xf32>, i32 -> vector<4x512xf32>
    %c7 = arith.constant 7 : index
    %c0_23 = arith.constant 0 : index
    %c0_24 = arith.constant 0 : index
    %43 = vector.load %arg2[%c7, %c0_23, %c0_24] : memref<9x1x512xf32, #tpu.memory_space<vmem>>, vector<1x1x512xf32>
    %44 = vector.shape_cast %43 : vector<1x1x512xf32> to vector<1x512xf32>
    %45 = vector.broadcast %44 : vector<1x512xf32> to vector<4x512xf32>
    %46 = arith.mulf %42, %45 : vector<4x512xf32>
    %c495_i32 = arith.constant 495 : i32
    %47 = tpu.dynamic_rotate %11 by %c495_i32 dim 1 : vector<4x512xf32>, i32 -> vector<4x512xf32>
    %c8 = arith.constant 8 : index
    %c0_25 = arith.constant 0 : index
    %c0_26 = arith.constant 0 : index
    %48 = vector.load %arg2[%c8, %c0_25, %c0_26] : memref<9x1x512xf32, #tpu.memory_space<vmem>>, vector<1x1x512xf32>
    %49 = vector.shape_cast %48 : vector<1x1x512xf32> to vector<1x512xf32>
    %50 = vector.broadcast %49 : vector<1x512xf32> to vector<4x512xf32>
    %51 = arith.mulf %47, %50 : vector<4x512xf32>
    %52 = tpu.concatenate %16, %21, %26, %31, %11, %36, %41, %46, %51 in 0 : vector<4x512xf32>, vector<4x512xf32>, vector<4x512xf32>, vector<4x512xf32>, vector<4x512xf32>, vector<4x512xf32>, vector<4x512xf32>, vector<4x512xf32>, vector<4x512xf32> -> vector<36x512xf32>
    %c0_27 = arith.constant 0 : index
    %c0_28 = arith.constant 0 : index
    %53 = vector.load %arg5[%c0_27, %c0_28] : memref<4x36xf32, #tpu.memory_space<vmem>>, vector<4x36xf32>
    %cst_29 = arith.constant dense<0.000000e+00> : vector<4x512xf32>
    %54 = tpu.matmul %53, %52, %cst_29 {dimension_numbers = #tpu.dot_dimension_numbers<[1], [0], [0], [1], [0, 0, 1, 1], [], []>} : vector<4x36xf32>, vector<36x512xf32>, vector<4x512xf32> -> vector<4x512xf32>
    %c0_30 = arith.constant 0 : index
    %c0_31 = arith.constant 0 : index
    %55 = vector.load %arg6[%c0_30, %c0_31] : memref<4x1xf32, #tpu.memory_space<vmem>>, vector<4x1xf32>
    %56 = vector.broadcast %55 : vector<4x1xf32> to vector<4x512xf32>
    %57 = arith.addf %54, %56 : vector<4x512xf32>
    %cst_32 = arith.constant 0.000000e+00 : f32
    %58 = vector.broadcast %cst_32 : f32 to vector<4x512xf32>
    %59 = arith.maximumf %57, %58 : vector<4x512xf32>
    %c0_33 = arith.constant 0 : index
    %c0_34 = arith.constant 0 : index
    %60 = vector.load %arg7[%c0_33, %c0_34] : memref<16x4xf32, #tpu.memory_space<vmem>>, vector<16x4xf32>
    %cst_35 = arith.constant dense<0.000000e+00> : vector<16x512xf32>
    %61 = tpu.matmul %60, %59, %cst_35 {dimension_numbers = #tpu.dot_dimension_numbers<[1], [0], [0], [1], [0, 0, 1, 1], [], []>} : vector<16x4xf32>, vector<4x512xf32>, vector<16x512xf32> -> vector<16x512xf32>
    %c0_36 = arith.constant 0 : index
    %c0_37 = arith.constant 0 : index
    %62 = vector.load %arg8[%c0_36, %c0_37] : memref<16x1xf32, #tpu.memory_space<vmem>>, vector<16x1xf32>
    %63 = vector.broadcast %62 : vector<16x1xf32> to vector<16x512xf32>
    %64 = arith.addf %61, %63 : vector<16x512xf32>
    %65 = arith.addf %64, %4 : vector<16x512xf32>
    %cst_38 = arith.constant 0.000000e+00 : f32
    %66 = vector.broadcast %cst_38 : f32 to vector<16x512xf32>
    %67 = arith.maximumf %65, %66 : vector<16x512xf32>
    %68 = vector.extract_strided_slice %67 {offsets = [0, 0], sizes = [16, 256], strides = [1, 1]} : vector<16x512xf32> to vector<16x256xf32>
    %c0_39 = arith.constant 0 : index
    %c0_40 = arith.constant 0 : index
    %c0_41 = arith.constant 0 : index
    %69 = vector.load %arg9[%c0_39, %c0_40, %c0_41] : memref<2x16x256xf32, #tpu.memory_space<vmem>>, vector<1x16x256xf32>
    %70 = vector.shape_cast %69 : vector<1x16x256xf32> to vector<16x256xf32>
    %71 = vector.shape_cast %68 : vector<16x256xf32> to vector<1x16x256xf32>
    tpu.vector_store %arg9[%c0_39, %c0_40, %c0_41], %71 {strides = array<i32>} : memref<2x16x256xf32, #tpu.memory_space<vmem>>, vector<1x16x256xf32>,
    %72 = vector.extract_strided_slice %67 {offsets = [0, 256], sizes = [16, 256], strides = [1, 1]} : vector<16x512xf32> to vector<16x256xf32>
    %c1_42 = arith.constant 1 : index
    %c0_43 = arith.constant 0 : index
    %c0_44 = arith.constant 0 : index
    %73 = vector.load %arg9[%c1_42, %c0_43, %c0_44] : memref<2x16x256xf32, #tpu.memory_space<vmem>>, vector<1x16x256xf32>
    %74 = vector.shape_cast %73 : vector<1x16x256xf32> to vector<16x256xf32>
    %75 = vector.shape_cast %72 : vector<16x256xf32> to vector<1x16x256xf32>
    tpu.vector_store %arg9[%c1_42, %c0_43, %c0_44], %75 {strides = array<i32>} : memref<2x16x256xf32, #tpu.memory_space<vmem>>, vector<1x16x256xf32>,
    return
  }
  func.func @transform_0(%arg0: i32) -> (i32, i32, i32) {
    %c0_i32 = arith.constant 0 : i32
    %c0_i32_0 = arith.constant 0 : i32
    %c0_i32_1 = arith.constant 0 : i32
    return %arg0, %c0_i32, %c0_i32_0 : i32, i32, i32
  }
  func.func @transform_1(%arg0: i32) -> (i32, i32, i32) {
    %c0_i32 = arith.constant 0 : i32
    %c0_i32_0 = arith.constant 0 : i32
    %c0_i32_1 = arith.constant 0 : i32
    %c0_i32_2 = arith.constant 0 : i32
    return %c0_i32, %c0_i32_0, %c0_i32_1 : i32, i32, i32
  }
  func.func @transform_2(%arg0: i32) -> (i32, i32) {
    %c0_i32 = arith.constant 0 : i32
    %c0_i32_0 = arith.constant 0 : i32
    %c0_i32_1 = arith.constant 0 : i32
    return %c0_i32, %c0_i32_0 : i32, i32
  }
  func.func @transform_3(%arg0: i32) -> (i32, i32) {
    %c0_i32 = arith.constant 0 : i32
    %c0_i32_0 = arith.constant 0 : i32
    %c0_i32_1 = arith.constant 0 : i32
    return %c0_i32, %c0_i32_0 : i32, i32
  }
  func.func @transform_4(%arg0: i32) -> (i32, i32) {
    %c0_i32 = arith.constant 0 : i32
    %c0_i32_0 = arith.constant 0 : i32
    %c0_i32_1 = arith.constant 0 : i32
    return %c0_i32, %c0_i32_0 : i32, i32
  }
  func.func @transform_5(%arg0: i32) -> (i32, i32) {
    %c0_i32 = arith.constant 0 : i32
    %c0_i32_0 = arith.constant 0 : i32
    %c0_i32_1 = arith.constant 0 : i32
    return %c0_i32, %c0_i32_0 : i32, i32
  }
  func.func @transform_6(%arg0: i32) -> (i32, i32) {
    %c0_i32 = arith.constant 0 : i32
    %c0_i32_0 = arith.constant 0 : i32
    %c0_i32_1 = arith.constant 0 : i32
    return %c0_i32, %c0_i32_0 : i32, i32
  }
  func.func @transform_7(%arg0: i32) -> (i32, i32) {
    %c0_i32 = arith.constant 0 : i32
    %c0_i32_0 = arith.constant 0 : i32
    %c0_i32_1 = arith.constant 0 : i32
    return %c0_i32, %c0_i32_0 : i32, i32
  }
  func.func @transform_8(%arg0: i32) -> (i32, i32, i32) {
    %c0_i32 = arith.constant 0 : i32
    %c0_i32_0 = arith.constant 0 : i32
    %c0_i32_1 = arith.constant 0 : i32
    return %arg0, %c0_i32, %c0_i32_0 : i32, i32, i32
  }
}

</mosaic_0001>

<bundles_post_ra>
// kernel: tpu_custom_call.1
= control target key start
LH: loop header
LB: loop body
LE: loop exit
PB: predicated region body
PF: predicated region fallthrough
CT: control target
= control target key end

     0   :  { %13 = vsyncpa [#allocation3], 0  ;;  %s1568_s0 = inlined_call_operand.hbm [shape: f32[2,16,256], index: 0, kind: input, shape index: {}]   ;;  %s1569_s1 = inlined_call_operand.vmem [shape: f32[9,1,512], index: 1, kind: input, shape index: {}]   ;;  %s1570_s2 = inlined_call_operand.vmem [shape: f32[4,16], index: 2, kind: input, shape index: {}]   ;;  %s1571_s3 = inlined_call_operand.vmem [shape: f32[4,1], index: 3, kind: input, shape index: {}]   ;;  %s1572_s4 = inlined_call_operand.vmem [shape: f32[4,36], index: 4, kind: input, shape index: {}]   ;;  %s1573_s5 = inlined_call_operand.vmem [shape: f32[4,1], index: 5, kind: input, shape index: {}]   ;;  %s1574_s6 = inlined_call_operand.vmem [shape: f32[16,4], index: 6, kind: input, shape index: {}]   ;;  %s1575_s7 = inlined_call_operand.vmem [shape: f32[16,1], index: 7, kind: input, shape index: {}]   ;;  %s1576_s8 = inlined_call_operand.hbm [shape: f32[2,16,256], index: 8, kind: output, shape index: {}]  }
   0x1   :  { %14 = vsyncpa [#allocation4], 0  ;;  %s1104_s27 = smov [#allocation2]   ;;  %s1056_s9 = scalar_lea.hbm %s1568_s0, 1024 }
   0x2   :  { %s20_s28 = sshll.u32 %s1104_s27, 4  ;;  %p1057_p0 = scmp.ne.s32.totalorder %s1568_s0, %s1056_s9  ;;  %s21_s28 = int_to_ptr.vmem [resolvable:$true] %s20_s28 }
   0x3   :  { %p1060_p1 = scmp.lt.u32.totalorder %s1056_s9, %s1568_s0 }
   0x5   :  { %p1062_p2 = pnand %p1060_p1, %p1057_p0 }
   0x7   :  { %1065 = shalt.err (!%p1062_p2)
}
   0x8   :  { %s1066_s14 = scalar_lea.vmem %s21_s28, 1024  ;;  %p1071_p4 = scmp.lt.s32.totalorder %s21_s28, %s21_s28 }
   0x9   :  { %p1067_p3 = scmp.ne.s32.totalorder %s21_s28, %s1066_s14  ;;  %p1072_p5 = scmp.lt.s32.totalorder %s1066_s14, %s1066_s14 }
   0xb   :  { %p1073_p6 = por %p1072_p5, %p1071_p4 }
   0xd   :  { %p1074_p7 = pnand %p1073_p6, %p1067_p3 }
   0xf   :  { %1077 = shalt.err (!%p1074_p7)
}
  0x10   :  { %s1105_s15 = smov 256   ;;  %s1106_s16 = smov 16  }
  0x11   :  { %26 = dma.hbm_to_vmem [thread:$0]  %s1568_s0, 1024, %s21_s28, [#allocation3], %s1105_s15, %s1105_s15, %s1106_s16  }
  0x12   :  { %1100 = dma.done.wait [#allocation3], 1024  }
  0x13   :  { %1101 = vsyncadd [#allocation3], 4294966272  ;;  %v1577_v0 = vmov 0.0   ;;  %v1108_v1 = vmov 0   ;;  %v1179_v2 = vld [vmem:[#allocation2 + $0x8] sm:$0xff]  ;;  %v1181_v3 = vld [vmem:[#allocation2 + $0x18] sm:$0xff]  ;;  %v218_v38 = vlaneseq }
  0x14   :  { %128 = vmatprep.mubr.f32.mxu0 %v1577_v0  ;;  %199 = vmatprep.mubr.f32.mxu1 %v1577_v0  ;;  %v1183_v4 = vld [vmem:[#allocation2 + $0x28] sm:$0xff]  ;;  %v1017_v5 = vpack.c.bf16 %v1181_v3, %v1179_v2  ;;  %v1187_v6 = vld [vmem:[#allocation2 + $0x38] sm:$0xff]  ;;  %v1189_v7 = vld [vmem:[#allocation2] sm:$0xff]  ;;  %vm60_vm0 = vcmask 130048   ;;  %s1111_s22 = smov 15   ;;  %s1112_s23 = smov 127  }
  0x15   :  { %1054 = vset.pattern.permute.xlu0 %v1108_v1  ;;  %1055 = vset.pattern.permute.xlu1 %v1108_v1  ;;  %v1191_v8 = vld [vmem:[#allocation2 + $0x10] sm:$0xff]  ;;  %v1021_v9 = vpack.c.bf16 %v1187_v6, %v1183_v4  ;;  %v1197_v11 = vld [vmem:[#allocation2 + $0x20] sm:$0xff]  ;;  %s1113_s24 = smov 112   ;;  %s1114_s25 = smov 113   ;;  %v768_v31 = vld [vmem:[%s1575_s7 + $0x8] sm:$0xff]  ;;  %v228_v41 = vshrl.u32 %v218_v38, 7 }
  0x16   :  { %v1019_v10 = vpack.c.bf16 %v1191_v8, %v1189_v7  ;;  %v1199_v12 = vld [vmem:[#allocation2 + $0x30] sm:$0xff]  ;;  %1018 = vmatprep.subr.bf16.mxu0 %v1017_v5  ;;  %v54_v14 = vld [vmem:[%s1571_s3] sm:$0xf]  ;;  %s1110_s3 = smov 17   ;;  %s1115_s26 = smov 111   ;;  %v1280_v42 = vand.u32 127, %v218_v38 }
  0x17   :  { %v1023_v13 = vpack.c.bf16 %v1199_v12, %v1197_v11  ;;  %1022 = vmatprep.subr.bf16.mxu1 %v1021_v9  ;;  %v53_v15 = vld [vmem:[%s1570_s2] sm:$0xf]  ;;  %57 = vperm.xlu0 %1054, %v54_v14   ;;  %s1109_s2 = smov 1   ;;  %v1286_v45 = vsub.s32 3, %v228_v41  ;;  %v1291_v46 = vld [vmem:[%s1569_s1 + $0x4] sm:$0xf] }
  0x18   :  { %1020 = vmatpush1.bf16.msra.mxu0 %v1019_v10  ;;  %v767_v29 = vld [vmem:[%s1575_s7] sm:$0xff]  ;;  %vm259_vm1 = vcmp.lt.s32.totalorder %v1280_v42, 16  ;;  %v1297_v48 = vld [vmem:[%s1569_s1 + $0xc] sm:$0xf]  ;;  %vm339_vm2 = vcmp.lt.s32.totalorder %v1280_v42, 1  ;;  %vm220_vm3 = vcmp.lt.s32.totalorder %v1280_v42, 17 }
  0x19   :  { %1024 = vmatpush1.bf16.msra.mxu1 %v1023_v13  ;;  %v597_v30 = vld [vmem:[%s1573_s5] sm:$0xf]  ;;  %v282_v50 = vrot.slane %v1291_v46, %v1286_v45  ;;  %v362_v51 = vrot.slane %v1297_v48, %v1286_v45  ;;  %v1328_v59 = vld [vmem:[%s1569_s1 + $0x8] sm:$0xf]  ;;  %v1330_v60 = vsub.s32 0, %v228_v41  ;;  %v1334_v1 = vsub.s32 1, %v228_v41 }
  0x1a   :  { %v1317_v54 = vld [vmem:[%s1569_s1] sm:$0xf]  ;;  %v322_v63 = vrot.slane %v1328_v59, %v1286_v45  ;;  %v1336_v5 = vsub.s32 2, %v228_v41  ;;  %vm299_vm4 = vcmp.lt.s32.totalorder %v1280_v42, 15  ;;  %vm579_vm5 = vcmask 1043456  }
  0x1b   :  { %994 = vmatmul.mubr.msk.f32.vlgmr.msra.gmra.mrb[0].mxu0 %vm60_vm0, %v53_v15  ;;  %v242_v55 = vrot.slane %v1317_v54, %v1286_v45  ;;  %v314_v41 = vrot.slane %v1328_v59, %v1334_v1  ;;  %vm379_vm6 = vcmp.lt.s32.totalorder %v1280_v42, 127  ;;  %vm459_vm7 = vcmp.lt.s32.totalorder %v1280_v42, 112 }
  0x1c   :  { %995 = vmatmul.mubr.msk.f32.vlgmr.msra.gmra.mrb[0].mxu1 %vm60_vm0, %v53_v15  ;;  %683 = vmatprep.mubr.f32.mxu0 %v1577_v0  ;;  %v270_v15 = vrot.slane %v1291_v46, %v1330_v60  ;;  %vm419_vm8 = vcmp.lt.s32.totalorder %v1280_v42, 113  ;;  %vm499_vm9 = vcmp.lt.s32.totalorder %v1280_v42, 111  ;;  %vm603_vm10 = vcmask 293888  }
  0x1d   :  { %754 = vmatprep.mubr.f32.mxu1 %v1577_v0  ;;  %v1583_v42 = vmov 0.0   ;;  %vm779_vm11 = vcmask 31744  }
  0x96   :  { %v58_v16 = vpop.permute.xlu0 %57 }
  0xee   :  { %v130_v17 = vpop.f32.mrb[0].mxu0 }
  0xef   :  { %v131_v18 = vadd.f32 %v130_v17, %v58_v16  ;;  %v201_v19 = vpop.f32.mrb[0].mxu1  ;;  %v132_v20 = vpop.f32.mrb[1].mxu0 }
  0xf0   :  { %v202_v21 = vadd.f32 %v201_v19, %v58_v16  ;;  %v203_v22 = vpop.f32.mrb[1].mxu1  ;;  %v133_v26 = vadd.f32 %v132_v20, %v58_v16  ;;  %v354_v19 = vrot.slane %v1297_v48, %v1334_v1  ;;  %v358_v20 = vrot.slane %v1297_v48, %v1336_v5 }
  0xf1   :  { %v1211_v23 = vmax.f32 %v131_v18, 0.0  ;;  %v204_v24 = vadd.f32 %v203_v22, %v58_v16  ;;  %v234_v22 = vrot.slane %v1317_v54, %v1334_v1 }
  0xf2   :  { %v1213_v25 = vmax.f32 %v202_v21, 0.0  ;;  %v1224_v28 = vmax.f32 %v133_v26, 0.0  ;;  %v350_v21 = vrot.slane %v1297_v48, %v1330_v60  ;;  %v238_v26 = vrot.slane %v1317_v54, %v1336_v5 }
  0xf3   :  { %251 = vrot.lane.b32.xlu0 %v1211_v23, %s1106_s16  ;;  %v1219_v27 = vmax.f32 %v204_v24, 0.0  ;;  %v1356_v24 = vld [vmem:[%s1569_s1 + $0x14] sm:$0xf]  ;;  %v318_v48 = vrot.slane %v1328_v59, %v1336_v5 }
  0xf4   :  { %255 = vrot.lane.b32.xlu1 %v1213_v25, %s1106_s16 }
  0xf7   :  { %257 = vrot.lane.b32.xlu0 %v1219_v27, %s1106_s16 }
  0xf8   :  { %331 = vrot.lane.b32.xlu1 %v1211_v23, %s1109_s2 }
  0xfb   :  { %333 = vrot.lane.b32.xlu0 %v1224_v28, %s1109_s2 }
  0xfc   :  { %335 = vrot.lane.b32.xlu1 %v1213_v25, %s1109_s2 }
  0xff   :  { %337 = vrot.lane.b32.xlu0 %v1219_v27, %s1109_s2 }
 0x100   :  { %210 = vrot.lane.b32.xlu1 %v1211_v23, %s1110_s3 }
 0x103   :  { %212 = vrot.lane.b32.xlu0 %v1224_v28, %s1110_s3 }
 0x104   :  { %214 = vrot.lane.b32.xlu1 %v1213_v25, %s1110_s3 }
 0x107   :  { %216 = vrot.lane.b32.xlu0 %v1219_v27, %s1110_s3 }
 0x108   :  { %291 = vrot.lane.b32.xlu1 %v1211_v23, %s1111_s22 }
 0x10b   :  { %293 = vrot.lane.b32.xlu0 %v1224_v28, %s1111_s22 }
 0x10c   :  { %295 = vrot.lane.b32.xlu1 %v1213_v25, %s1111_s22 }
 0x10f   :  { %297 = vrot.lane.b32.xlu0 %v1219_v27, %s1111_s22 }
 0x110   :  { %371 = vrot.lane.b32.xlu1 %v1211_v23, %s1112_s23 }
 0x113   :  { %373 = vrot.lane.b32.xlu0 %v1224_v28, %s1112_s23 }
 0x114   :  { %375 = vrot.lane.b32.xlu1 %v1213_v25, %s1112_s23 }
 0x117   :  { %377 = vrot.lane.b32.xlu0 %v1219_v27, %s1112_s23 }
 0x118   :  { %451 = vrot.lane.b32.xlu1 %v1211_v23, %s1113_s24 }
 0x11b   :  { %453 = vrot.lane.b32.xlu0 %v1224_v28, %s1113_s24 }
 0x11c   :  { %455 = vrot.lane.b32.xlu1 %v1213_v25, %s1113_s24 }
 0x11f   :  { %457 = vrot.lane.b32.xlu0 %v1219_v27, %s1113_s24 }
 0x120   :  { %253 = vrot.lane.b32.xlu1 %v1224_v28, %s1106_s16 }
 0x123   :  { %413 = vrot.lane.b32.xlu0 %v1224_v28, %s1114_s25 }
 0x124   :  { %411 = vrot.lane.b32.xlu1 %v1211_v23, %s1114_s25 }
 0x127   :  { %417 = vrot.lane.b32.xlu0 %v1219_v27, %s1114_s25 }
 0x128   :  { %415 = vrot.lane.b32.xlu1 %v1213_v25, %s1114_s25 }
 0x12b   :  { %493 = vrot.lane.b32.xlu0 %v1224_v28, %s1115_s26 }
 0x12c   :  { %491 = vrot.lane.b32.xlu1 %v1211_v23, %s1115_s26 }
 0x12f   :  { %497 = vrot.lane.b32.xlu0 %v1219_v27, %s1115_s26 }
 0x130   :  { %495 = vrot.lane.b32.xlu1 %v1213_v25, %s1115_s26 }
 0x133   :  { %771 = vperm.xlu0 %1054, %v767_v29   ;;  %v230_v29 = vrot.slane %v1317_v54, %v1330_v60 }
 0x134   :  { %600 = vperm.xlu1 %1055, %v597_v30  }
 0x138   :  { %776 = vperm.xlu1 %1055, %v768_v31  }
 0x165   :  { %v1264_v32 = vpop.permute.xlu0 %251 }
 0x166   :  { %v1266_v33 = vpop.permute.xlu1 %255 }
 0x169   :  { %v1268_v34 = vpop.permute.xlu0 %257 }
 0x16a   :  { %v1270_v35 = vpop.permute.xlu1 %331  ;;  %v260_v52 = vsel %vm259_vm1, %v1266_v33, %v1268_v34 }
 0x16b   :  { %v290_v61 = vmul.f32 %v282_v50, %v260_v52  ;;  %v310_v50 = vrot.slane %v1328_v59, %v1330_v60  ;;  %v263_v59 = vsel %vm259_vm1, %v1268_v34, %v1264_v32 }
 0x16d   :  { %v1272_v36 = vpop.permute.xlu0 %333  ;;  %v538_v16 = vrot.slane %v290_v61, 4 }
 0x16e   :  { %v1274_v37 = vpop.permute.xlu1 %335  ;;  %v342_v61 = vsel %vm339_vm2, %v1270_v35, %v1272_v36 }
 0x171   :  { %v1276_v39 = vpop.permute.xlu0 %337 }
 0x172   :  { %v1278_v40 = vpop.permute.xlu1 %210  ;;  %v340_v53 = vsel %vm339_vm2, %v1274_v37, %v1276_v39  ;;  %v343_v34 = vsel %vm339_vm2, %v1276_v39, %v1270_v35  ;;  %v278_v35 = vrot.slane %v1291_v46, %v1336_v5  ;;  %v1418_v39 = vld [vmem:[%s1569_s1 + $0x18] sm:$0xf] }
 0x173   :  { %v370_v62 = vmul.f32 %v362_v51, %v340_v53  ;;  %v1373_v53 = vld [vmem:[%s1569_s1 + $0x1c] sm:$0xf] }
 0x175   :  { %v1282_v43 = vpop.permute.xlu0 %212  ;;  %v550_v17 = vrot.slane %v370_v62, 4  ;;  %v402_v62 = vrot.slane %v1356_v24, %v1286_v45 }
 0x176   :  { %v1284_v44 = vpop.permute.xlu1 %214 }
 0x179   :  { %v217_v47 = vpop.permute.xlu0 %216 }
 0x17a   :  { %v1299_v49 = vpop.permute.xlu1 %291  ;;  %v221_v57 = vsel %vm220_vm3, %v1284_v44, %v217_v47 }
 0x17b   :  { %v250_v9 = vmul.f32 %v242_v55, %v221_v57  ;;  %v394_v55 = vrot.slane %v1356_v24, %v1334_v1  ;;  %v482_v57 = vrot.slane %v1373_v53, %v1286_v45 }
 0x17d   :  { %v294_v56 = vpop.permute.xlu0 %293  ;;  %v583_v31 = vsel %vm579_vm5, %v250_v9, %v538_v16  ;;  %v367_v16 = vmul.f32 %v350_v21, %v343_v34 }
 0x17e   :  { %v296_v58 = vpop.permute.xlu1 %295 }
 0x181   :  { %v298_v10 = vpop.permute.xlu0 %297 }
 0x182   :  { %v1339_v13 = vpop.permute.xlu1 %371  ;;  %v300_v14 = vsel %vm299_vm4, %v296_v58, %v298_v10 }
 0x183   :  { %v330_v18 = vmul.f32 %v322_v63, %v300_v14  ;;  %v341_v63 = vsel %vm339_vm2, %v1272_v36, %v1274_v37  ;;  %v470_v14 = vrot.slane %v1373_v53, %v1330_v60  ;;  %v302_v36 = vsel %vm299_vm4, %v1299_v49, %v294_v56 }
 0x184   :  { %v369_v0 = vmul.f32 %v358_v20, %v341_v63  ;;  %v328_v54 = vmul.f32 %v314_v41, %v302_v36  ;;  %v223_v20 = vsel %vm220_vm3, %v1278_v40, %v1282_v43 }
 0x185   :  { %v374_v30 = vpop.permute.xlu0 %373  ;;  %v587_v38 = vsel %vm579_vm5, %v330_v18, %v550_v17  ;;  %v224_v17 = vsel %vm220_vm3, %v217_v47, %v1278_v40  ;;  %v274_v18 = vrot.slane %v1291_v46, %v1334_v1  ;;  %v301_v47 = vsel %vm299_vm4, %v294_v56, %v296_v58 }
 0x186   :  { %v376_v51 = vpop.permute.xlu1 %375  ;;  %v1033_v52 = vpack.c.bf16 %v587_v38, %v583_v31  ;;  %v287_v31 = vmul.f32 %v270_v15, %v263_v59  ;;  %v368_v38 = vmul.f32 %v354_v19, %v342_v61  ;;  %v247_v46 = vmul.f32 %v230_v29, %v224_v17 }
 0x187   :  { %v303_v15 = vsel %vm299_vm4, %v298_v10, %v1299_v49  ;;  %v430_v56 = vrot.slane %v1418_v39, %v1330_v60  ;;  %v222_v58 = vsel %vm220_vm3, %v1282_v43, %v1284_v44  ;;  %v329_v21 = vmul.f32 %v318_v48, %v301_v47 }
 0x188   :  { %1034 = vmatprep.subr.bf16.mxu1 %v1033_v52  ;;  %v478_v52 = vrot.slane %v1373_v53, %v1336_v5  ;;  %v535_v49 = vrot.slane %v287_v31, 4  ;;  %v548_v10 = vrot.slane %v368_v38, 4  ;;  %v381_v59 = vsel %vm379_vm6, %v374_v30, %v376_v51 }
 0x189   :  { %v378_v9 = vpop.permute.xlu0 %377  ;;  %v438_v61 = vrot.slane %v1418_v39, %v1336_v5  ;;  %v549_v63 = vrot.slane %v369_v0, 4  ;;  %v547_v44 = vrot.slane %v367_v16, 4  ;;  %v327_v34 = vmul.f32 %v310_v50, %v303_v15 }
 0x18a   :  { %v452_v37 = vpop.permute.xlu1 %451  ;;  %v442_v17 = vrot.slane %v1418_v39, %v1286_v45  ;;  %v248_v40 = vmul.f32 %v234_v22, %v223_v20  ;;  %v249_v43 = vmul.f32 %v238_v26, %v222_v58  ;;  %v580_v48 = vsel %vm579_vm5, %v247_v46, %v535_v49 }
 0x18b   :  { %v585_v31 = vsel %vm579_vm5, %v328_v54, %v548_v10  ;;  %v586_v38 = vsel %vm579_vm5, %v329_v21, %v549_v63  ;;  %v382_v47 = vsel %vm379_vm6, %v1339_v13, %v374_v30  ;;  %v408_v41 = vmul.f32 %v394_v55, %v381_v59 }
 0x18c   :  { %v383_v0 = vsel %vm379_vm6, %v378_v9, %v1339_v13  ;;  %v380_v22 = vsel %vm379_vm6, %v376_v51, %v378_v9  ;;  %v584_v55 = vsel %vm579_vm5, %v327_v34, %v547_v44  ;;  %v1579_v51 = vrot.slane %v1356_v24, %v1330_v60 }
 0x18d   :  { %v454_v19 = vpop.permute.xlu0 %453  ;;  %v410_v15 = vmul.f32 %v402_v62, %v383_v0  ;;  %v560_v10 = vrot.slane %v408_v41, 4  ;;  %v1027_v63 = vpack.c.bf16 %v584_v55, %v580_v48 }
 0x18e   :  { %v456_v29 = vpop.permute.xlu1 %455  ;;  %v462_v26 = vsel %vm459_vm7, %v452_v37, %v454_v19  ;;  %v407_v9 = vmul.f32 %v1579_v51, %v382_v47 }
 0x18f   :  { %v461_v58 = vsel %vm459_vm7, %v454_v19, %v456_v29  ;;  %v1581_v19 = vrot.slane %v1373_v53, %v1334_v1  ;;  %v562_v34 = vrot.slane %v410_v15, 4 }
 0x190   :  { %v559_v0 = vrot.slane %v407_v9, 4 }
 0x191   :  { %v458_v36 = vpop.permute.xlu0 %457 }
 0x192   :  { %v254_v50 = vpop.permute.xlu1 %253  ;;  %v463_v13 = vsel %vm459_vm7, %v458_v36, %v452_v37 }
 0x193   :  { %v261_v54 = vsel %vm259_vm1, %v254_v50, %v1266_v33  ;;  %v262_v30 = vsel %vm259_vm1, %v1264_v32, %v254_v50  ;;  %v460_v33 = vsel %vm459_vm7, %v456_v29, %v458_v36  ;;  %v1580_v32 = vrot.slane %v1356_v24, %v1336_v5 }
 0x194   :  { %v288_v16 = vmul.f32 %v274_v18, %v262_v30  ;;  %v289_v46 = vmul.f32 %v278_v35, %v261_v54  ;;  %v487_v35 = vmul.f32 %v470_v14, %v462_v26  ;;  %v490_v59 = vmul.f32 %v482_v57, %v463_v13 }
 0x195   :  { %v414_v20 = vpop.permute.xlu0 %413  ;;  %v409_v18 = vmul.f32 %v1580_v32, %v380_v22  ;;  %v488_v29 = vmul.f32 %v1581_v19, %v461_v58  ;;  %v489_v24 = vmul.f32 %v478_v52, %v460_v33  ;;  %v591_v13 = vsel %vm579_vm5, %v1219_v27, %v562_v34 }
 0x196   :  { %v536_v21 = vrot.slane %v288_v16, 4  ;;  %v537_v49 = vrot.slane %v289_v46, 4  ;;  %v412_v37 = vpop.permute.xlu1 %411  ;;  %v571_v22 = vrot.slane %v487_v35, 4  ;;  %v574_v54 = vrot.slane %v490_v59, 4  ;;  %v596_v59 = vld [vmem:[%s1572_s4] sm:$0xf] }
 0x197   :  { %v422_v62 = vsel %vm419_vm8, %v412_v37, %v414_v20  ;;  %v561_v50 = vrot.slane %v409_v18, 4  ;;  %v589_v46 = vsel %vm579_vm5, %v1224_v28, %v560_v10  ;;  %v588_v28 = vsel %vm579_vm5, %v1211_v23, %v559_v0 }
 0x198   :  { %v582_v44 = vsel %vm579_vm5, %v249_v43, %v537_v49  ;;  %v581_v14 = vsel %vm579_vm5, %v248_v40, %v536_v21  ;;  %v447_v36 = vmul.f32 %v430_v56, %v422_v62  ;;  %v572_v56 = vrot.slane %v488_v29, 4 }
 0x199   :  { %v418_v47 = vpop.permute.xlu0 %417  ;;  %v1025_v41 = vpack.c.bf16 %v585_v31, %v581_v14  ;;  %v1035_v57 = vpack.c.bf16 %v586_v38, %v582_v44  ;;  %v573_v43 = vrot.slane %v489_v24, 4  ;;  %v1582_v31 = vrot.slane %v1418_v39, %v1334_v1 }
 0x19a   :  { %v416_v48 = vpop.permute.xlu1 %415  ;;  %v423_v26 = vsel %vm419_vm8, %v418_v47, %v412_v37  ;;  %v592_v55 = vsel %vm579_vm5, %v447_v36, %v571_v22  ;;  %v590_v51 = vsel %vm579_vm5, %v1213_v25, %v561_v50  ;;  %v765_v50 = vld [vmem:[%s1574_s6] sm:$0xff] }
 0x19b   :  { %v421_v53 = vsel %vm419_vm8, %v414_v20, %v416_v48  ;;  %v420_v52 = vsel %vm419_vm8, %v416_v48, %v418_v47  ;;  %v450_v40 = vmul.f32 %v442_v17, %v423_v26  ;;  %1026 = vmatprep.subr.bf16.mxu0 %v1025_v41  ;;  %1036 = vmatpush1.bf16.msra.mxu1 %v1035_v57  ;;  %v766_v48 = vld [vmem:[%s1574_s6 + $0x8] sm:$0xff]  ;;  %s1116_s6 = smov [#allocation5]  }
 0x19c   :  { %v448_v38 = vmul.f32 %v1582_v31, %v421_v53  ;;  %v449_v30 = vmul.f32 %v438_v61, %v420_v52  ;;  %1028 = vmatpush1.bf16.msra.mxu0 %v1027_v63  ;;  %v1002_v61 = vld [vmem:[%s1569_s1 + $0x20] sm:$0xf]  ;;  %v1031_v32 = vpack.c.bf16 %v592_v55, %v588_v28  ;;  %s982_s28 = sshll.u32 %s1116_s6, 4  ;;  %s983_s28 = int_to_ptr.vmem [resolvable:$true] %s982_s28 }
 0x19d   :  { %v494_v16 = vpop.permute.xlu0 %493  ;;  %v595_v17 = vsel %vm579_vm5, %v450_v40, %v574_v54  ;;  %v522_v20 = vrot.slane %v1002_v61, %v1286_v45  ;;  %v514_v25 = vrot.slane %v1002_v61, %v1334_v1  ;;  %v518_v18 = vrot.slane %v1002_v61, %v1336_v5  ;;  %s1078_s29 = scalar_lea.vmem %s983_s28, 1024  ;;  %p1083_p9 = scmp.lt.s32.totalorder %s983_s28, %s983_s28 }
 0x19e   :  { %v594_v9 = vsel %vm579_vm5, %v449_v30, %v573_v43  ;;  %v492_v39 = vpop.permute.xlu1 %491  ;;  %v593_v15 = vsel %vm579_vm5, %v448_v38, %v572_v56  ;;  %v1037_v58 = vpack.c.bf16 %v595_v17, %v591_v13  ;;  %v510_v35 = vrot.slane %v1002_v61, %v1330_v60  ;;  %p1079_p8 = scmp.ne.s32.totalorder %s983_s28, %s1078_s29  ;;  %p1084_p10 = scmp.lt.s32.totalorder %s1078_s29, %s1078_s29 }
 0x19f   :  { %v1029_v33 = vpack.c.bf16 %v593_v15, %v589_v46  ;;  %v1039_v27 = vpack.c.bf16 %v594_v9, %v590_v51  ;;  %v502_v49 = vsel %vm499_vm9, %v492_v39, %v494_v16 }
 0x1a0   :  { %1038 = vmatprep.subr.bf16.mxu1 %v1037_v58  ;;  %v527_v62 = vmul.f32 %v510_v35, %v502_v49  ;;  %p1085_p11 = por %p1084_p10, %p1083_p9 }
 0x1a1   :  { %1030 = vmatprep.subr.bf16.mxu0 %v1029_v33  ;;  %1040 = vmatpush1.bf16.msra.mxu1 %v1039_v27  ;;  %v498_v21 = vpop.permute.xlu0 %497 }
 0x1a2   :  { %v496_v37 = vpop.permute.xlu1 %495  ;;  %1032 = vmatpush1.bf16.msra.mxu0 %v1031_v32  ;;  %v503_v23 = vsel %vm499_vm9, %v498_v21, %v492_v39  ;;  %p1086_p12 = pnand %p1085_p11, %p1079_p8 }
 0x1a3   :  { %v501_v45 = vsel %vm499_vm9, %v494_v16, %v496_v37  ;;  %v500_v1 = vsel %vm499_vm9, %v496_v37, %v498_v21  ;;  %v530_v5 = vmul.f32 %v522_v20, %v503_v23 }
 0x1a4   :  { %v528_v10 = vmul.f32 %v514_v25, %v501_v45  ;;  %v529_v60 = vmul.f32 %v518_v18, %v500_v1 }
 0x1a5   :  { %1006 = vmatprep.subr.msk.mxu1 %vm579_vm5, %v530_v5 }
 0x1a6   :  { %1003 = vmatprep.subr.msk.mxu0 %vm579_vm5, %v528_v10  ;;  %1007 = vmatpush1.msk.msra.mxu1 %vm579_vm5, %v529_v60 }
 0x1a7   :  { %1004 = vmatpush1.msk.msra.mxu0 %vm579_vm5, %v527_v62  ;;  %1008 = vmatmul.mubr.msk.f32.vlgmr.msra.gmra.mrb[2].mxu1 %vm603_vm10, %v596_v59 }
 0x1a8   :  { %1005 = vmatmul.mubr.msk.f32.vlgmr.msra.gmra.mrb[2].mxu0 %vm603_vm10, %v596_v59  ;;  %939 = vmatprep.mubr.f32.mxu1 %v1583_v42 }
 0x1a9   :  { %862 = vmatprep.mubr.f32.mxu0 %v1583_v42 }
 0x1b2   :  { %v772_v26 = vpop.permute.xlu0 %771 }
 0x1b3   :  { %v601_v63 = vpop.permute.xlu1 %600 }
 0x1b7   :  { %v777_v55 = vpop.permute.xlu1 %776 }
 0x27a   :  { %v756_v19 = vpop.f32.mrb[2].mxu1 }
 0x27b   :  { %v685_v29 = vpop.f32.mrb[2].mxu0  ;;  %v757_v44 = vadd.f32 %v756_v19, %v601_v63  ;;  %v758_v24 = vpop.f32.mrb[3].mxu1 }
 0x27c   :  { %v686_v14 = vadd.f32 %v685_v29, %v601_v63  ;;  %v687_v34 = vpop.f32.mrb[3].mxu0  ;;  %v759_v36 = vadd.f32 %v758_v24, %v601_v63 }
 0x27d   :  { %v688_v47 = vadd.f32 %v687_v34, %v601_v63  ;;  %v763_v57 = vmax.f32 %v757_v44, 0.0 }
 0x27e   :  { %v764_v41 = vmax.f32 %v759_v36, 0.0  ;;  %v761_v22 = vmax.f32 %v686_v14, 0.0 }
 0x27f   :  { %v762_v0 = vmax.f32 %v688_v47, 0.0 }
 0x280   :  { %1013 = vmatprep.subr.msk.mxu1 %vm579_vm5, %v764_v41 }
 0x281   :  { %1009 = vmatprep.subr.msk.mxu0 %vm579_vm5, %v762_v0  ;;  %1014 = vmatpush1.msk.msra.mxu1 %vm579_vm5, %v763_v57 }
 0x282   :  { %1010 = vmatpush1.msk.msra.mxu0 %vm579_vm5, %v761_v22  ;;  %1015 = vmatmul.mubr.msk.f32.vlgmr.msra.gmra.mrb[4].mxu1 %vm779_vm11, %v765_v50 }
 0x283   :  { %1011 = vmatmul.mubr.msk.f32.vlgmr.msra.gmra.mrb[4].mxu0 %vm779_vm11, %v765_v50  ;;  %945 = vmatprep.mubr.f32.mxu1 %v1583_v42 }
 0x284   :  { %868 = vmatprep.mubr.f32.mxu0 %v1583_v42 }
 0x286   :  { %1016 = vmatmul.mubr.msk.f32.gmra.mrb[6].mxu1 %vm779_vm11, %v766_v48 }
 0x287   :  { %1012 = vmatmul.mubr.msk.f32.gmra.mrb[6].mxu0 %vm779_vm11, %v766_v48 }
 0x355   :  { %v941_v54 = vpop.f32.mrb[4].mxu1 }
 0x356   :  { %v864_v53 = vpop.f32.mrb[4].mxu0  ;;  %v942_v52 = vadd.f32 %v941_v54, %v772_v26  ;;  %v943_v40 = vpop.f32.mrb[5].mxu1 }
 0x357   :  { %v865_v56 = vadd.f32 %v864_v53, %v772_v26  ;;  %v866_v43 = vpop.f32.mrb[5].mxu0  ;;  %v944_v31 = vadd.f32 %v943_v40, %v772_v26 }
 0x358   :  { %v954_v38 = vadd.f32 %v942_v52, %v1197_v11  ;;  %v867_v30 = vadd.f32 %v866_v43, %v772_v26 }
 0x359   :  { %v952_v16 = vadd.f32 %v865_v56, %v1189_v7  ;;  %v955_v46 = vadd.f32 %v944_v31, %v1183_v4  ;;  %v947_v13 = vpop.f32.mrb[6].mxu1 }
 0x35a   :  { %v962_v17 = vmax.f32 %v954_v38, 0.0  ;;  %v953_v51 = vadd.f32 %v867_v30, %v1179_v2  ;;  %v870_v9 = vpop.f32.mrb[6].mxu0  ;;  %v948_v39 = vadd.f32 %v947_v13, %v777_v55  ;;  %v949_v61 = vpop.f32.mrb[7].mxu1 }
 0x35b   :  { %v960_v15 = vmax.f32 %v952_v16, 0.0  ;;  %v963_v58 = vmax.f32 %v955_v46, 0.0  ;;  %v871_v28 = vadd.f32 %v870_v9, %v777_v55  ;;  %v872_v33 = vpop.f32.mrb[7].mxu0  ;;  %v950_v27 = vadd.f32 %v949_v61, %v777_v55 }
 0x35c   :  { %973 = vst [vmem:[#allocation5 + $0x20] sm:$0xff] %v962_v17  ;;  %v961_v11 = vmax.f32 %v953_v51, 0.0  ;;  %v958_v20 = vadd.f32 %v948_v39, %v1199_v12  ;;  %v873_v25 = vadd.f32 %v872_v33, %v777_v55 }
 0x35d   :  { %968 = vst [vmem:[#allocation5] sm:$0xff] %v960_v15  ;;  %974 = vst [vmem:[#allocation5 + $0x28] sm:$0xff] %v963_v58  ;;  %v956_v4 = vadd.f32 %v871_v28, %v1191_v8  ;;  %v959_v7 = vadd.f32 %v950_v27, %v1187_v6 }
 0x35e   :  { %969 = vst [vmem:[#allocation5 + $0x8] sm:$0xff] %v961_v11  ;;  %v966_v2 = vmax.f32 %v958_v20, 0.0  ;;  %v957_v32 = vadd.f32 %v873_v25, %v1181_v3 }
 0x35f   :  { %v964_v18 = vmax.f32 %v956_v4, 0.0  ;;  %v967_v35 = vmax.f32 %v959_v7, 0.0 }
 0x360   :  { %975 = vst [vmem:[#allocation5 + $0x30] sm:$0xff] %v966_v2  ;;  %v965_v21 = vmax.f32 %v957_v32, 0.0 }
 0x361   :  { %970 = vst [vmem:[#allocation5 + $0x10] sm:$0xff] %v964_v18  ;;  %976 = vst [vmem:[#allocation5 + $0x38] sm:$0xff] %v967_v35 }
 0x362   :  { %971 = vst [vmem:[#allocation5 + $0x18] sm:$0xff] %v965_v21 }
 0x363   :  { %1089 = shalt.err (!%p1086_p12)
}
 0x364   :  { %s1090_s10 = scalar_lea.hbm %s1576_s8, 1024 }
 0x365   :  { %p1091_p13 = scmp.ne.s32.totalorder %s1576_s8, %s1090_s10  ;;  %p1094_p0 = scmp.lt.u32.totalorder %s1090_s10, %s1576_s8 }
 0x367   :  { %p1096_p1 = pnand %p1094_p0, %p1091_p13 }
 0x369   :  { %1099 = shalt.err (!%p1096_p1)
}
 0x36a   :  { %988 = dma.vmem_to_hbm [thread:$0]  %s983_s28, 1024, %s1576_s8, [#allocation4], %s1105_s15, %s1105_s15, %s1106_s16  }
 0x36b   :  { %1102 = dma.done.wait [#allocation4], 1024  }
 0x36c   :  { %1103 = vsyncadd [#allocation4], 4294966272 }
 0x36d   :  { %992 = vsyncpa [#allocation3], 1 }
 0x36e   :  { %993 = vsyncpa [#allocation4], 1 }

</bundles_post_ra>
